<compile_context>
chip_gen: v7x
topology: tpu7x:2x2x1
jax: 0.10.0
libtpu: 0.0.40
codegen_flags: <defaults>
</compile_context>

<pallas_src>
import numpy as np

import jax
import jax.numpy as jnp
from jax import lax
from jax.experimental import pallas as pl
from jax.experimental.pallas import tpu as pltpu


def _head_kernel(x_ref, w_ref, bias_ref, o_ref):
    # x_ref:    (B*T, C)      flattened activations
    # w_ref:    (C, 3H)       fused [key | query | value] projection weights
    # bias_ref: (B*T, B*T)    block-diagonal causal additive bias (0 / -inf)
    # o_ref:    (B*T, H)
    H = o_ref.shape[-1]

    x = x_ref[...]
    w = w_ref[...]

    # One fused projection matmul instead of three narrow ones.
    kqv = jnp.dot(x, w, preferred_element_type=jnp.float32)        # (BT, 3H)
    k = kqv[:, 0 * H:1 * H]
    q = kqv[:, 1 * H:2 * H] * (H ** -0.5)   # fold scale into q: O(BT*H) work
    v = kqv[:, 2 * H:3 * H]

    # Attention scores without materializing k.T: contract last dims.
    s = lax.dot_general(
        q, k,
        dimension_numbers=(((1,), (1,)), ((), ())),
        preferred_element_type=jnp.float32,                        # (BT, BT)
    )

    # Block-diagonal causal mask as an additive bias (0 allowed, -inf masked).
    s = s + bias_ref[...]

    # Numerically stable softmax; normalization deferred to the (BT, H) output.
    m = jnp.max(s, axis=-1, keepdims=True)
    p = jnp.exp(s - m)                       # masked entries -> exp(-inf) = 0
    denom = jnp.sum(p, axis=-1, keepdims=True)

    # TODO(synk): nn.Dropout on the attention weights is identity at inference
    # (and with dropout=0.0); stochastic dropout is not applied here.

    out = jnp.dot(p, v, preferred_element_type=jnp.float32)        # (BT, H)
    out = out * pl.reciprocal(denom, approx=False)  # exact; approx=True if tolerance allows

    o_ref[...] = out.astype(o_ref.dtype)


@jax.jit
def head_forward(x, w_key, w_query, w_value):
    """x: (B, T, C) f32; w_*: (C, H) f32 -> (B, T, H) f32."""
    B, T, C = x.shape
    H = w_key.shape[1]
    BT = B * T

    # Fuse the projection weights once (ideally done at parameter-init time;
    # under jit this concat is folded into the surrounding graph).
    w_kqv = jnp.concatenate([w_key, w_query, w_value], axis=1)      # (C, 3H)
    x2d = x.reshape(BT, C)

    # Static block-diagonal causal bias: token i attends to token j iff they
    # are in the same batch element and j <= i.  Computed with numpy at trace
    # time -> an XLA constant, zero per-call cost.
    tril = np.tril(np.ones((T, T), dtype=np.float32))
    block = np.kron(np.eye(B, dtype=np.float32), tril)              # (BT, BT)
    attn_bias = jnp.asarray(
        np.where(block > 0.0, 0.0, -np.inf).astype(np.float32))

    cost = pl.CostEstimate(
        flops=2 * BT * C * (3 * H) + 2 * BT * BT * H * 2,
        transcendentals=BT * BT,
        bytes_accessed=4 * (BT * C + C * 3 * H + BT * BT + BT * H),
    )

    out2d = pl.pallas_call(
        _head_kernel,
        out_shape=jax.ShapeDtypeStruct((BT, H), jnp.float32),
        grid_spec=pltpu.PrefetchScalarGridSpec(
            num_scalar_prefetch=0,
            grid=(1,),  # single step: whole problem is a few KB of VMEM
            in_specs=[
                pl.BlockSpec((BT, C), lambda i: (0, 0)),
                pl.BlockSpec((C, 3 * H), lambda i: (0, 0)),
                pl.BlockSpec((BT, BT), lambda i: (0, 0)),
            ],
            out_specs=pl.BlockSpec((BT, H), lambda i: (0, 0)),
        ),
        compiler_params=pltpu.CompilerParams(
            dimension_semantics=("arbitrary",)),
        cost_estimate=cost,
    )(x2d, w_kqv, attn_bias)

    return out2d.reshape(B, T, H)


def _reference_head(x, w_key, w_query, w_value):
    """Pure-JAX reference mirroring the PyTorch forward (dropout = identity)."""
    k = x @ w_key
    q = x @ w_query
    v = x @ w_value
    scale = k.shape[-1] ** (-0.5)
    wei = jnp.einsum("btd,bsd->bts", q, k) * scale
    T = x.shape[1]
    tril = jnp.tril(jnp.ones((T, T)))
    wei = jnp.where(tril == 0, -jnp.inf, wei)
    wei = jax.nn.softmax(wei, axis=-1)
    return wei @ v


if __name__ == "__main__":
    # Small config implied by the module: n_embd=32, block_size=8, head_size=16
    B, T, C, H = 2, 8, 32, 16

    key = jax.random.PRNGKey(0)
    kx, kk, kq, kv = jax.random.split(key, 4)

    x = jax.random.normal(kx, (B, T, C), dtype=jnp.float32)
    # Deterministic "Linear(bias=False)"-style init, stored as (C, H).
    w_key = jax.random.normal(kk, (C, H), dtype=jnp.float32) * (C ** -0.5)
    w_query = jax.random.normal(kq, (C, H), dtype=jnp.float32) * (C ** -0.5)
    w_value = jax.random.normal(kv, (C, H), dtype=jnp.float32) * (C ** -0.5)

    out = jax.block_until_ready(head_forward(x, w_key, w_query, w_value))

    ref = _reference_head(x, w_key, w_query, w_value)
    assert out.shape == (B, T, H), out.shape
    assert jnp.allclose(out, ref, atol=1e-4, rtol=1e-4), "mismatch vs reference"

    print("KERNEL_OK")
</pallas_src>

<mosaic_0001>
module attributes {stable_mosaic.version = 11 : i64} {
  func.func @_head_kernel(%arg0: i32, %arg1: memref<16x32xf32, #tpu.memory_space<vmem>>, %arg2: memref<32x48xf32, #tpu.memory_space<vmem>>, %arg3: memref<16x16xf32, #tpu.memory_space<vmem>>, %arg4: memref<16x16xf32, #tpu.memory_space<vmem>>) attributes {dimension_semantics = [#tpu.dimension_semantics<arbitrary>], iteration_bounds = array<i64: 1>, scalar_prefetch = 0 : i64, scratch_operands = 0 : i64, tpu.core_type = #tpu.core_type<tc>, window_params = [{pipeline_mode = #tpu.pipeline_mode<synchronous>, transform_indices = @transform_0, window_bounds = array<i64: 16, 32>}, {pipeline_mode = #tpu.pipeline_mode<synchronous>, transform_indices = @transform_1, window_bounds = array<i64: 32, 48>}, {pipeline_mode = #tpu.pipeline_mode<synchronous>, transform_indices = @transform_2, window_bounds = array<i64: 16, 16>}, {pipeline_mode = #tpu.pipeline_mode<synchronous>, transform_indices = @transform_3, window_bounds = array<i64: 16, 16>}]} {
    %c0 = arith.constant 0 : index
    %c0_0 = arith.constant 0 : index
    %0 = vector.load %arg1[%c0, %c0_0] : memref<16x32xf32, #tpu.memory_space<vmem>>, vector<16x32xf32>
    %c0_1 = arith.constant 0 : index
    %c0_2 = arith.constant 0 : index
    %1 = vector.load %arg2[%c0_1, %c0_2] : memref<32x48xf32, #tpu.memory_space<vmem>>, vector<32x48xf32>
    %cst = arith.constant dense<0.000000e+00> : vector<16x48xf32>
    %2 = tpu.matmul %0, %1, %cst {dimension_numbers = #tpu.dot_dimension_numbers<[1], [0], [0], [1], [0, 0, 1, 1], [], []>} : vector<16x32xf32>, vector<32x48xf32>, vector<16x48xf32> -> vector<16x48xf32>
    %3 = vector.extract_strided_slice %2 {offsets = [0, 0], sizes = [16, 16], strides = [1, 1]} : vector<16x48xf32> to vector<16x16xf32>
    %4 = vector.extract_strided_slice %2 {offsets = [0, 16], sizes = [16, 16], strides = [1, 1]} : vector<16x48xf32> to vector<16x16xf32>
    %cst_3 = arith.constant 2.500000e-01 : f32
    %5 = vector.broadcast %cst_3 : f32 to vector<16x16xf32>
    %6 = arith.mulf %4, %5 : vector<16x16xf32>
    %7 = vector.extract_strided_slice %2 {offsets = [0, 32], sizes = [16, 16], strides = [1, 1]} : vector<16x48xf32> to vector<16x16xf32>
    %cst_4 = arith.constant dense<0.000000e+00> : vector<16x16xf32>
    %8 = tpu.matmul %6, %3, %cst_4 {dimension_numbers = #tpu.dot_dimension_numbers<[1], [1], [0], [0], [0, 0, 1, 0], [], []>} : vector<16x16xf32>, vector<16x16xf32>, vector<16x16xf32> -> vector<16x16xf32>
    %c0_5 = arith.constant 0 : index
    %c0_6 = arith.constant 0 : index
    %9 = vector.load %arg3[%c0_5, %c0_6] : memref<16x16xf32, #tpu.memory_space<vmem>>, vector<16x16xf32>
    %10 = arith.addf %8, %9 : vector<16x16xf32>
    %cst_7 = arith.constant dense<0xFF800000> : vector<16xf32>
    %11 = vector.multi_reduction <maximumf>, %10, %cst_7 [1] : vector<16x16xf32> to vector<16xf32>
    %12 = vector.shape_cast %11 : vector<16xf32> to vector<16x1xf32>
    %13 = vector.broadcast %12 : vector<16x1xf32> to vector<16x16xf32>
    %14 = arith.subf %10, %13 : vector<16x16xf32>
    %15 = math.exp %14 : vector<16x16xf32>
    %cst_8 = arith.constant dense<0.000000e+00> : vector<16xf32>
    %16 = vector.multi_reduction <add>, %15, %cst_8 [1] : vector<16x16xf32> to vector<16xf32>
    %17 = vector.shape_cast %16 : vector<16xf32> to vector<16x1xf32>
    %cst_9 = arith.constant dense<0.000000e+00> : vector<16x16xf32>
    %18 = tpu.matmul %15, %7, %cst_9 {dimension_numbers = #tpu.dot_dimension_numbers<[1], [0], [0], [1], [0, 0, 1, 1], [], []>} : vector<16x16xf32>, vector<16x16xf32>, vector<16x16xf32> -> vector<16x16xf32>
    %19 = tpu.reciprocal %17 : vector<16x1xf32> -> vector<16x1xf32>
    %20 = vector.broadcast %19 : vector<16x1xf32> to vector<16x16xf32>
    %21 = arith.mulf %18, %20 : vector<16x16xf32>
    %c0_10 = arith.constant 0 : index
    %c0_11 = arith.constant 0 : index
    %22 = vector.load %arg4[%c0_10, %c0_11] : memref<16x16xf32, #tpu.memory_space<vmem>>, vector<16x16xf32>
    tpu.vector_store %arg4[%c0_10, %c0_11], %21 {strides = array<i32>} : memref<16x16xf32, #tpu.memory_space<vmem>>, vector<16x16xf32>,
    return
  }
  func.func @transform_0(%arg0: i32) -> (i32, i32) {
    %c0_i32 = arith.constant 0 : i32
    %c0_i32_0 = arith.constant 0 : i32
    %c0_i32_1 = arith.constant 0 : i32
    return %c0_i32, %c0_i32_0 : i32, i32
  }
  func.func @transform_1(%arg0: i32) -> (i32, i32) {
    %c0_i32 = arith.constant 0 : i32
    %c0_i32_0 = arith.constant 0 : i32
    %c0_i32_1 = arith.constant 0 : i32
    return %c0_i32, %c0_i32_0 : i32, i32
  }
  func.func @transform_2(%arg0: i32) -> (i32, i32) {
    %c0_i32 = arith.constant 0 : i32
    %c0_i32_0 = arith.constant 0 : i32
    %c0_i32_1 = arith.constant 0 : i32
    return %c0_i32, %c0_i32_0 : i32, i32
  }
  func.func @transform_3(%arg0: i32) -> (i32, i32) {
    %c0_i32 = arith.constant 0 : i32
    %c0_i32_0 = arith.constant 0 : i32
    %c0_i32_1 = arith.constant 0 : i32
    return %c0_i32, %c0_i32_0 : i32, i32
  }
}

</mosaic_0001>

<bundles_post_ra>
// kernel: head_forward.1
= control target key start
LH: loop header
LB: loop body
LE: loop exit
PB: predicated region body
PF: predicated region fallthrough
CT: control target
= control target key end

     0   :  { %vm21_vm0 = vcmask 261120   ;;  %s506_s0 = inlined_call_operand.vmem [shape: f32[16,32], index: 0, kind: input, shape index: {}]   ;;  %s507_s1 = inlined_call_operand.vmem [shape: f32[32,48], index: 1, kind: input, shape index: {}]   ;;  %s508_s2 = inlined_call_operand.vmem [shape: f32[16,16], index: 2, kind: input, shape index: {}]   ;;  %s509_s3 = inlined_call_operand.hbm [shape: f32[16,16], index: 3, kind: output, shape index: {}]  }
   0x1   :  { %v17_v0 = vld [vmem:[%s507_s1] sm:$0xff]  ;;  %v18_v1 = vld [vmem:[%s507_s1 + $0x8] sm:$0xff]  ;;  %v19_v2 = vld [vmem:[%s507_s1 + $0x10] sm:$0xff] }
   0x2   :  { %v373_v3 = vpack.c.bf16 %v18_v1, %v17_v0  ;;  %v20_v4 = vld [vmem:[%s507_s1 + $0x18] sm:$0xff]  ;;  %v15_v5 = vld [vmem:[%s506_s0] sm:$0xff] }
   0x3   :  { %v377_v6 = vpack.c.bf16 %v20_v4, %v19_v2  ;;  %356 = vmatprep.mubr.msk.f32.mxu0 %vm21_vm0, %v15_v5 }
   0x4   :  { %8 = vsyncpa [#allocation3], 0  ;;  %374 = vmatprep.subr.bf16.mxu0 %v373_v3  ;;  %v16_v7 = vld [vmem:[%s506_s0 + $0x8] sm:$0xff]  ;;  %vm113_vm1 = vcmask 130048   ;;  %s433_s1 = smov 112   ;;  %s434_s24 = smov 96  }
   0x5   :  { %376 = vmatpush3.bf16.msra.mxu0 %v373_v3  ;;  %vm382_vm2 = vmpackc.low %vm113_vm1, %vm113_vm1  ;;  %v105_v20 = vld [vmem:[%s508_s2] sm:$0xff]  ;;  %v106_v22 = vld [vmem:[%s508_s2 + $0x8] sm:$0xff]  ;;  %s435_s2 = smov [#allocation2]  }
   0x6   :  { %378 = vmatprep.subr.bf16.mxu0 %v377_v6  ;;  %s315_s28 = sshll.u32 %s435_s2, 4  ;;  %s316_s28 = int_to_ptr.vmem [resolvable:$true] %s315_s28 }
   0x7   :  { %s409_s29 = scalar_lea.vmem %s316_s28, 256  ;;  %p414_p1 = scmp.lt.s32.totalorder %s316_s28, %s316_s28 }
   0x8   :  { %p410_p0 = scmp.ne.s32.totalorder %s316_s28, %s409_s29  ;;  %p415_p2 = scmp.lt.s32.totalorder %s409_s29, %s409_s29 }
   0x9   :  { %380 = vmatpush3.bf16.msra.mxu0 %v377_v6 }
   0xa   :  { %p416_p3 = por %p415_p2, %p414_p1 }
   0xc   :  { %357 = vmatmul.mubr.msk.f32.vlgmr.msra.gmra.mrb[0].mxu0 %vm21_vm0, %v16_v7  ;;  %p417_p4 = pnand %p416_p3, %p410_p0 }
  0xdf   :  { %v358_v8 = vpop.f32.mrb[0].mxu0 }
  0xe0   :  { %v94_v9 = vpop.f32.mrb[1].mxu0  ;;  %v104_v13 = vmul.f32 0.25, %v358_v8 }
  0xe1   :  { %v396_v10 = vpack.i.bf16 %v358_v8, %v94_v9  ;;  %v381_v11 = vpack.c.bf16 %v358_v8, %v94_v9  ;;  %v103_v12 = vmul.f32 0.25, %v94_v9 }
  0xe3   :  { %383 = vmatprep.subr.msk.bf16.mxu1 %vm382_vm2, %v381_v11  ;;  %109 = vrot.lane.b32.xlu0 %v103_v12, %s433_s1 }
  0xe4   :  { %386 = vmatpush3.bf16.xpose.msk.msra.mxu1 %vm382_vm2, %v381_v11 }
  0xe7   :  { %111 = vrot.lane.b32.xlu0 %v104_v13, %s433_s1 }
  0xeb   :  { %397 = vrot.lane.b32.xlu0 %v396_v10, %s434_s24 }
 0x155   :  { %v110_v14 = vpop.permute.xlu0 %109 }
 0x156   :  { %363 = vmatprep.mubr.msk.f32.mxu1 %vm113_vm1, %v110_v14 }
 0x159   :  { %v112_v15 = vpop.permute.xlu0 %111 }
 0x15a   :  { %364 = vmatmul.mubr.msk.f32.vlgmr.msra.gmra.mrb[0].mxu1 %vm113_vm1, %v112_v15 }
 0x15d   :  { %v398_v16 = vpop.permute.xlu0 %397 }
 0x15e   :  { %v400_v17 = vunpack.i.h.bf16 %v398_v16  ;;  %v399_v18 = vunpack.i.l.bf16 %v398_v16 }
 0x160   :  { %v387_v19 = vpack.c.bf16 %v400_v17, %v399_v18 }
 0x162   :  { %388 = vmatprep.subr.bf16.mxu0 %v387_v19 }
 0x163   :  { %390 = vmatpush3.bf16.msra.mxu0 %v387_v19 }
 0x22d   :  { %v365_v21 = vpop.f32.mrb[0].mxu1 }
 0x22e   :  { %v190_v23 = vpop.f32.mrb[1].mxu1  ;;  %v196_v25 = vadd.f32 %v365_v21, %v106_v22 }
 0x22f   :  { %v191_v24 = vadd.f32 %v190_v23, %v105_v20 }
 0x230   :  { %v202_v27 = vsel %vm113_vm1, %v196_v25, -inf }
 0x231   :  { %v199_v26 = vsel %vm113_vm1, %v191_v24, -inf }
 0x232   :  { %200 = vmax.xlane.f32.xlu1 %v199_v26 }
 0x236   :  { %203 = vmax.xlane.f32.xlu1 %v202_v27 }
 0x2bf   :  { %v201_v28 = vpop.xlane.xlu1 %200 }
 0x2c0   :  { %v205_v29 = vsub.f32 %v191_v24, %v201_v28 }
 0x2c2   :  { %v207_v30 = vmul.f32 1.442695, %v205_v29 }
 0x2c3   :  { %v204_v31 = vpop.xlane.xlu1 %203 }
 0x2c4   :  { %401 = vpow2.f32 %v207_v30  ;;  %v206_v32 = vsub.f32 %v196_v25, %v204_v31 }
 0x2c6   :  { %v209_v33 = vmul.f32 1.442695, %v206_v32 }
 0x2c8   :  { %403 = vpow2.f32 %v209_v33 }
 0x2ce   :  { %v402_v34 = vpop.eup %401 }
 0x2cf   :  { %370 = vmatprep.mubr.msk.f32.mxu0 %vm113_vm1, %v402_v34  ;;  %v211_v35 = vsel %vm113_vm1, %v402_v34, 0.0 }
 0x2d0   :  { %212 = vadd.xlane.f32.xlu1 %v211_v35 }
 0x2d2   :  { %v404_v36 = vpop.eup %403 }
 0x2d3   :  { %371 = vmatmul.mubr.msk.f32.vlgmr.msra.gmra.mrb[2].mxu0 %vm113_vm1, %v404_v36  ;;  %v214_v37 = vsel %vm113_vm1, %v404_v36, 0.0 }
 0x2d4   :  { %215 = vadd.xlane.f32.xlu0 %v214_v37 }
 0x35d   :  { %v213_v39 = vpop.xlane.xlu1 %212 }
 0x361   :  { %v216_v38 = vpop.xlane.xlu0 %215 }
 0x362   :  { %405 = vrcp.f32 %v216_v38 }
 0x363   :  { %407 = vrcp.f32 %v213_v39 }
 0x36c   :  { %v406_v40 = vpop.eup %405 }
 0x36d   :  { %v408_v42 = vpop.eup %407 }
 0x3a6   :  { %v372_v41 = vpop.f32.mrb[2].mxu0 }
 0x3a7   :  { %v307_v43 = vmul.f32 %v406_v40, %v372_v41  ;;  %v295_v44 = vpop.f32.mrb[3].mxu0 }
 0x3a8   :  { %v306_v45 = vmul.f32 %v408_v42, %v295_v44 }
 0x3a9   :  { %309 = vst.msk [vmem:[#allocation2 + $0x8] sm:$0xff] %vm113_vm1, %v307_v43 }
 0x3aa   :  { %308 = vst.msk [vmem:[#allocation2] sm:$0xff] %vm113_vm1, %v306_v45 }
 0x3ab   :  { %420 = shalt.err (!%p417_p4)
}
 0x3ac   :  { %s421_s5 = scalar_lea.hbm %s509_s3, 256 }
 0x3ad   :  { %p422_p5 = scmp.ne.s32.totalorder %s509_s3, %s421_s5  ;;  %p425_p6 = scmp.lt.u32.totalorder %s421_s5, %s509_s3 }
 0x3af   :  { %p427_p7 = pnand %p425_p6, %p422_p5 }
 0x3b1   :  { %430 = shalt.err (!%p427_p7)
}
 0x3b2   :  { %s436_s10 = smov 128   ;;  %s437_s11 = smov 8  }
 0x3b3   :  { %321 = dma.vmem_to_hbm [thread:$0]  %s316_s28, 256, %s509_s3, [#allocation3], %s436_s10, %s436_s10, %s437_s11  }
 0x3b4   :  { %431 = dma.done.wait [#allocation3], 256  }
 0x3b5   :  { %432 = vsyncadd [#allocation3], 4294967040 }
 0x3b6   :  { %325 = vsyncpa [#allocation3], 1 }

</bundles_post_ra>
